<compile_context>
chip_gen: v6e
topology: v6e:2x2x1
jax: 0.10.0
libtpu: 0.0.40
codegen_flags: <defaults>
</compile_context>

<pallas_src>
import functools

import jax
import jax.numpy as jnp
from jax.experimental import pallas as pl
from jax.experimental.pallas import tpu as pltpu

ACT_NONE, ACT_SILU, ACT_LEAKY = 0, 1, 2
_TM = 2048           # pixel (lane) tile per grid step; large to amortize step overhead
_LANES = 128         # TPU lane width
_LEAKY_SLOPE = 0.01
_BN_EPS = 1e-5       # PyTorch nn.BatchNorm2d default


# ----------------------------- Pallas kernel --------------------------------

def _conv_bn_act_kernel(x_ref, w_ref, b_ref, o_ref, *, act):
    # o = act(W @ X + b): bf16 MXU matmul (Cout,K)@(K,tm); f32 accumulate+epilogue.
    y = jnp.dot(w_ref[...], x_ref[...], preferred_element_type=jnp.float32)
    y = y + b_ref[...]                       # (Cout, 1) broadcast over lanes
    if act == ACT_SILU:
        y = y * jax.nn.sigmoid(y)
    elif act == ACT_LEAKY:
        y = jnp.where(y >= 0.0, y, _LEAKY_SLOPE * y)
    o_ref[...] = y.astype(o_ref.dtype)


def conv_bn_act(x_kp, w_ck, bias_c1, act, out_dtype=jnp.bfloat16):
    """x_kp: (K, P) bf16 activations (pixels on lanes); w_ck: (Cout, K) bf16 with
    the BN scale pre-folded; bias_c1: (Cout, 1) f32  ->  (Cout, P) out_dtype."""
    K, P = x_kp.shape
    Cout = w_ck.shape[0]

    tm = min(_TM, pl.cdiv(P, _LANES) * _LANES)   # lane tile, multiple of 128
    Pp = pl.cdiv(P, tm) * tm
    if Pp != P:
        # TODO(synk): mask the ragged last pixel tile in-kernel instead of padding.
        x_kp = jnp.pad(x_kp, ((0, 0), (0, Pp - P)))

    out = pl.pallas_call(
        functools.partial(_conv_bn_act_kernel, act=act),
        out_shape=jax.ShapeDtypeStruct((Cout, Pp), out_dtype),
        grid=(Pp // tm,),
        in_specs=[
            pl.BlockSpec((K, tm), lambda i: (0, i)),      # activations: pixel tile
            pl.BlockSpec((Cout, K), lambda i: (0, 0)),    # folded weights (tiny)
            pl.BlockSpec((Cout, 1), lambda i: (0, 0)),    # folded BN bias (tiny)
        ],
        out_specs=pl.BlockSpec((Cout, tm), lambda i: (0, i)),
        compiler_params=pltpu.CompilerParams(
            dimension_semantics=("parallel",)),
    )(x_kp, w_ck, bias_c1)
    return out[:, :P] if Pp != P else out


# ----------------------------- layout glue -----------------------------------

def _im2col_cm(x, kh, kw, stride, pad):
    """x: (C, N, H, W) channel-major -> (kh*kw*C, N, Ho, Wo). Identity for 1x1/s1."""
    if pad:
        x = jnp.pad(x, ((0, 0), (0, 0), (pad, pad), (pad, pad)))
    C, N, Hp, Wp = x.shape
    Ho = (Hp - kh) // stride + 1
    Wo = (Wp - kw) // stride + 1
    if kh == 1 and kw == 1 and stride == 1:
        return x, Ho, Wo
    # TODO(synk): for k>1 do the patch gather in-kernel (halo'd BlockSpec blocks)
    #             instead of materializing the k*k-inflated activation in HBM.
    cols = [x[:, :, i:i + (Ho - 1) * stride + 1:stride,
                    j:j + (Wo - 1) * stride + 1:stride]
            for i in range(kh) for j in range(kw)]
    return jnp.concatenate(cols, axis=0), Ho, Wo


# ----------------------------- parameters ------------------------------------

def init_focus_params(key, input_c, output_c, k_size=1, e=1.0):
    output_c = round(output_c * e)
    cin = input_c * 4                                   # channels after space-to-depth
    k1, k2, k3, k4, k5 = jax.random.split(key, 5)
    fan_in = cin * k_size * k_size
    w = jax.random.normal(k1, (output_c, cin, k_size, k_size),
                          jnp.float32) / jnp.sqrt(fan_in)     # PyTorch OIHW layout
    gamma = 1.0 + 0.1 * jax.random.normal(k2, (output_c,), jnp.float32)
    beta = 0.1 * jax.random.normal(k3, (output_c,), jnp.float32)
    mean = 0.1 * jax.random.normal(k4, (output_c,), jnp.float32)
    var = jnp.abs(jax.random.normal(k5, (output_c,), jnp.float32)) + 0.5
    return dict(input_c=input_c, output_c=output_c, k_size=k_size,
                w=w, bn=(gamma, beta, mean, var))


# ----------------------------- forward ---------------------------------------

def focus_forward(params, x_nchw, stride=1, padding=None, act=ACT_SILU,
                  out_dtype=jnp.bfloat16):
    k = params["k_size"]
    if padding is None:
        padding = k // 2                      # autopad; 0 for the 1x1 Focus default
    Cout = params["output_c"]
    N = x_nchw.shape[0]

    # bf16 cast FIRST (halves prep-pass bytes), then channel-major (C, N, H, W)
    # and space-to-depth: concat the 4 stride-2 samplings along the channel axis
    # in the reference order.  Pure layout glue, fused by XLA into one pass.
    x = jnp.transpose(x_nchw.astype(jnp.bfloat16), (1, 0, 2, 3))
    s2d = jnp.concatenate(
        [x[:, :, 0::2, 0::2], x[:, :, 1::2, 0::2],
         x[:, :, 0::2, 1::2], x[:, :, 1::2, 1::2]], axis=0)

    # im2col (identity for the 1x1 default) + flatten: pixels become lanes.
    cols, Ho, Wo = _im2col_cm(s2d, k, k, stride, padding)
    K = cols.shape[0]
    x_kp = cols.reshape(K, N * Ho * Wo)

    # Fold BN (inference, running stats): scale into the weights, bias stays as
    # a tiny f32 epilogue add.  K index order = ((ki*kw+kj)*C + c) matches im2col.
    gamma, beta, mean, var = params["bn"]
    s = gamma / jnp.sqrt(var + _BN_EPS)
    w_mat = jnp.transpose(params["w"], (0, 2, 3, 1)).reshape(Cout, K)
    w_folded = (w_mat * s[:, None]).astype(jnp.bfloat16)
    bias = (beta - mean * s).reshape(Cout, 1).astype(jnp.float32)

    out = conv_bn_act(x_kp, w_folded, bias, act, out_dtype)   # (Cout, P)

    # Channel-major result -> NCHW (just a leading-axis transpose; reshape if N==1).
    out = out.reshape(Cout, N, Ho, Wo)
    return jnp.transpose(out, (1, 0, 2, 3))


# ----------------------------- reference (f32, pure JAX) ----------------------

def focus_reference(params, x_nchw, stride=1, padding=None):
    k = params["k_size"]
    if padding is None:
        padding = k // 2
    x = x_nchw.astype(jnp.float32)
    s2d = jnp.concatenate(
        [x[:, :, 0::2, 0::2], x[:, :, 1::2, 0::2],
         x[:, :, 0::2, 1::2], x[:, :, 1::2, 1::2]], axis=1)
    y = jax.lax.conv_general_dilated(
        s2d, params["w"], (stride, stride), [(padding, padding)] * 2,
        dimension_numbers=("NCHW", "OIHW", "NCHW"))
    gamma, beta, mean, var = params["bn"]
    s = gamma / jnp.sqrt(var + _BN_EPS)
    y = y * s[None, :, None, None] + (beta - mean * s)[None, :, None, None]
    return y * jax.nn.sigmoid(y)


# ----------------------------- demo -------------------------------------------

if __name__ == "__main__":
    key = jax.random.PRNGKey(0)
    kp, kx = jax.random.split(key)

    # Focus(input_c=4, output_c=8, k_size=1, stride=1, pading=None, act=True)
    params = init_focus_params(kp, input_c=4, output_c=8, k_size=1, e=1.0)

    x = jax.random.normal(kx, (2, 4, 16, 16), jnp.float32)   # NCHW like PyTorch

    out = focus_forward(params, x, stride=1, padding=None, act=ACT_SILU)
    out = jax.block_until_ready(out)

    assert out.shape == (2, params["output_c"], 8, 8), out.shape
    assert bool(jnp.all(jnp.isfinite(out)))

    # bf16 kernel vs f32 reference: agree to roughly bf16 relative precision.
    ref = focus_reference(params, x)
    err = float(jnp.max(jnp.abs(out.astype(jnp.float32) - ref)))
    assert err < 5e-2, f"max abs err {err}"
    print("KERNEL_OK")
</pallas_src>

<mosaic_0001>
module attributes {stable_mosaic.version = 11 : i64} {
  func.func @_conv_bn_act_kernel(%arg0: i32, %arg1: memref<16x128xbf16, #tpu.memory_space<vmem>>, %arg2: memref<8x16xbf16, #tpu.memory_space<vmem>>, %arg3: memref<8x1xf32, #tpu.memory_space<vmem>>, %arg4: memref<8x128xbf16, #tpu.memory_space<vmem>>) attributes {dimension_semantics = [#tpu.dimension_semantics<parallel>], iteration_bounds = array<i64: 1>, scalar_prefetch = 0 : i64, scratch_operands = 0 : i64, tpu.core_type = #tpu.core_type<tc>, window_params = [{transform_indices = @transform_0, window_bounds = array<i64: 16, 128>}, {pipeline_mode = #tpu.pipeline_mode<synchronous>, transform_indices = @transform_1, window_bounds = array<i64: 8, 16>}, {pipeline_mode = #tpu.pipeline_mode<synchronous>, transform_indices = @transform_2, window_bounds = array<i64: 8, 1>}, {transform_indices = @transform_3, window_bounds = array<i64: 8, 128>}]} {
    %c0 = arith.constant 0 : index
    %c0_0 = arith.constant 0 : index
    %0 = vector.load %arg2[%c0, %c0_0] : memref<8x16xbf16, #tpu.memory_space<vmem>>, vector<8x16xbf16>
    %c0_1 = arith.constant 0 : index
    %c0_2 = arith.constant 0 : index
    %1 = vector.load %arg1[%c0_1, %c0_2] : memref<16x128xbf16, #tpu.memory_space<vmem>>, vector<16x128xbf16>
    %cst = arith.constant dense<0.000000e+00> : vector<8x128xf32>
    %2 = tpu.matmul %0, %1, %cst {dimension_numbers = #tpu.dot_dimension_numbers<[1], [0], [0], [1], [0, 0, 1, 1], [], []>} : vector<8x16xbf16>, vector<16x128xbf16>, vector<8x128xf32> -> vector<8x128xf32>
    %c0_3 = arith.constant 0 : index
    %c0_4 = arith.constant 0 : index
    %3 = vector.load %arg3[%c0_3, %c0_4] : memref<8x1xf32, #tpu.memory_space<vmem>>, vector<8x1xf32>
    %4 = vector.broadcast %3 : vector<8x1xf32> to vector<8x128xf32>
    %5 = arith.addf %2, %4 : vector<8x128xf32>
    %6 = arith.negf %5 : vector<8x128xf32>
    %7 = math.exp %6 : vector<8x128xf32>
    %cst_5 = arith.constant 1.000000e+00 : f32
    %8 = vector.broadcast %cst_5 : f32 to vector<8x128xf32>
    %9 = arith.addf %8, %7 : vector<8x128xf32>
    %10 = arith.divf %8, %9 : vector<8x128xf32>
    %11 = arith.mulf %5, %10 : vector<8x128xf32>
    %12 = arith.truncf %11 : vector<8x128xf32> to vector<8x128xbf16>
    %c0_6 = arith.constant 0 : index
    %c0_7 = arith.constant 0 : index
    %13 = vector.load %arg4[%c0_6, %c0_7] : memref<8x128xbf16, #tpu.memory_space<vmem>>, vector<8x128xbf16>
    tpu.vector_store %arg4[%c0_6, %c0_7], %12 {strides = array<i32>} : memref<8x128xbf16, #tpu.memory_space<vmem>>, vector<8x128xbf16>,
    return
  }
  func.func @transform_0(%arg0: i32) -> (i32, i32) {
    %c0_i32 = arith.constant 0 : i32
    %c0_i32_0 = arith.constant 0 : i32
    return %c0_i32, %arg0 : i32, i32
  }
  func.func @transform_1(%arg0: i32) -> (i32, i32) {
    %c0_i32 = arith.constant 0 : i32
    %c0_i32_0 = arith.constant 0 : i32
    %c0_i32_1 = arith.constant 0 : i32
    return %c0_i32, %c0_i32_0 : i32, i32
  }
  func.func @transform_2(%arg0: i32) -> (i32, i32) {
    %c0_i32 = arith.constant 0 : i32
    %c0_i32_0 = arith.constant 0 : i32
    %c0_i32_1 = arith.constant 0 : i32
    return %c0_i32, %c0_i32_0 : i32, i32
  }
  func.func @transform_3(%arg0: i32) -> (i32, i32) {
    %c0_i32 = arith.constant 0 : i32
    %c0_i32_0 = arith.constant 0 : i32
    return %c0_i32, %arg0 : i32, i32
  }
}

</mosaic_0001>

<bundles_post_ra>
// kernel: tpu_custom_call.1
= control target key start
LH: loop header
LB: loop body
LE: loop exit
PB: predicated region body
PF: predicated region fallthrough
CT: control target
= control target key end

     0   :  { %8 = vsyncpa [#allocation3], 0  ;;  %s214_s0 = inlined_call_operand.vmem [shape: bf16[16,128], index: 0, kind: input, shape index: {}]   ;;  %s215_s1 = inlined_call_operand.hbm [shape: bf16[8,16], index: 1, kind: input, shape index: {}]   ;;  %s216_s2 = inlined_call_operand.vmem [shape: f32[8,1], index: 2, kind: input, shape index: {}]   ;;  %s217_s3 = inlined_call_operand.hbm [shape: bf16[8,128], index: 3, kind: output, shape index: {}]  }
   0x1   :  { %9 = vsyncpa [#allocation4], 0  ;;  %s177_s12 = smov [#allocation2]  }
   0x2   :  { %s18_s13 = sshll.u32 %s177_s12, 4  ;;  %s19_s13 = int_to_ptr.vmem [resolvable:$true] %s18_s13 }
   0x3   :  { %s141_s14 = scalar_lea.vmem %s19_s13, 64  ;;  %p146_p1 = scmp.lt.s32.totalorder %s19_s13, %s19_s13 }
   0x4   :  { %p142_p0 = scmp.ne.s32.totalorder %s19_s13, %s141_s14  ;;  %p147_p2 = scmp.lt.s32.totalorder %s141_s14, %s141_s14 }
   0x6   :  { %p148_p3 = por %p147_p2, %p146_p1 }
   0x8   :  { %p149_p4 = pnand %p148_p3, %p142_p0 }
   0xa   :  { %152 = shalt.err (!%p149_p4)
}
   0xb   :  { %21 = dma.hbm_to_vmem [thread:$0]  %s215_s1, 64, %s19_s13, [#allocation3]  }
   0xc   :  { %173 = dma.done.wait [#allocation3], 64  }
   0xd   :  { %174 = vsyncadd [#allocation3], 4294967232  ;;  %v178_v0 = vmov 0.0   ;;  %vm179_vm0 = vmmov 0   ;;  %v180_v1 = vmov 0   ;;  %v128_v2 = vld [vmem:[%s214_s0] sm:$0xff]  }
   0xe   :  { %116 = vmatprep.subr.bf16.mxu0 %v178_v0  ;;  %118 = vmatprep.mubr.msk.bf16.mxu0 %vm179_vm0, %v178_v0  ;;  %v31_v3 = vld [vmem:[%s216_s2] sm:$0xff]  ;;  %vm43_vm1 = vcmask 130048   ;;  %s181_s0 = smov [#allocation5]  }
   0xf   :  { %127 = vset.pattern.permute.xlu0 %v180_v1  ;;  %117 = vmatpush3.bf16.msra.mxu0 %v128_v2  ;;  %v28_v4 = vld [vmem:[#allocation2] sm:$0xf]  ;;  %s102_s1 = sshll.u32 %s181_s0, 4  ;;  %s103_s1 = int_to_ptr.vmem [resolvable:$true] %s102_s1 }
  0x10   :  { %34 = vperm.xlu0 %127, %v31_v3   ;;  %s153_s2 = scalar_lea.vmem %s103_s1, 64  ;;  %p158_p6 = scmp.lt.s32.totalorder %s103_s1, %s103_s1 }
  0x11   :  { %p154_p5 = scmp.ne.s32.totalorder %s103_s1, %s153_s2  ;;  %p159_p7 = scmp.lt.s32.totalorder %s153_s2, %s153_s2 }
  0x12   :  { %119 = vmatmul.mubr.msk.bf16.vlgmr.msra.gmra.mxu0 %vm43_vm1, %v28_v4 }
  0x13   :  { %p160_p8 = por %p159_p7, %p158_p6 }
  0x15   :  { %p161_p9 = pnand %p160_p8, %p154_p5 }
  0x8b   :  { %v35_v5 = vpop.permute.xlu0 %34 }
  0xd2   :  { %v81_v6 = vpop.f32.mrf.mxu0 }
  0xd3   :  { %v82_v7 = vadd.f32 %v81_v6, %v35_v5 }
  0xd4   :  { %v120_v8 = vpop.f32.mrf.mxu0 }
  0xd5   :  { %v113_v9 = vmul.f32 -1.442695, %v82_v7 }
  0xd6   :  { %v84_v10 = vpop.f32.mrf.mxu0 }
  0xd7   :  { %129 = vpow2.f32 %v113_v9 }
  0xd8   :  { %v121_v11 = vpop.f32.mrf.mxu0 }
  0xe4   :  { %v130_v12 = vpop.eup %129 }
  0xe5   :  { %v90_v13 = vadd.f32 1.0, %v130_v12 }
  0xe7   :  { %131 = vrcp.f32 %v90_v13 }
  0xf4   :  { %v132_v14 = vpop.eup %131 }
  0xf5   :  { %v93_v15 = vmul.f32 %v132_v14, %v82_v7 }
  0xf7   :  { %v94_v16 = vpack.c.bf16 %v93_v15, %v93_v15 }
  0xf9   :  { %95 = vst [vmem:[#allocation5] sm:$0xf] %v94_v16 }
  0xfa   :  { %164 = shalt.err (!%p161_p9)
}
  0xfb   :  { %105 = dma.vmem_to_hbm [thread:$0]  %s103_s1, 64, %s217_s3, [#allocation4]  }
  0xfc   :  { %175 = dma.done.wait [#allocation4], 64  }
  0xfd   :  { %176 = vsyncadd [#allocation4], 4294967232 }
  0xfe   :  { %109 = vsyncpa [#allocation3], 1 }
  0xff   :  { %110 = vsyncpa [#allocation4], 1 }

</bundles_post_ra>
